<compile_context>
chip_gen: v7x
topology: tpu7x:2x2x1
jax: 0.10.0
libtpu: 0.0.40
codegen_flags: <defaults>
</compile_context>

<pallas_src>
import jax
import jax.numpy as jnp
from jax.experimental import pallas as pl
from jax.experimental.pallas import tpu as pltpu  # noqa: F401  (kept for TPU-specific tuning hooks)


# ----------------------------------------------------------------------------
# Single fused kernel: full LSTM recurrence + fc(relu(fc_1(hn))) head.
# Everything (x, weights, h, c) is VMEM-resident for the whole call
# (< 100 KiB at these shapes), so there is exactly one HBM->VMEM fill and one
# VMEM->HBM writeback.
# ----------------------------------------------------------------------------
def lstm_s_kernel(x_ref, h0_ref, c0_ref, wih_ref, whh_ref, b_ref,
                  w1_ref, b1_ref, w2_ref, b2_ref,
                  out_ref, hn_ref, cn_ref):
    B, H = h0_ref.shape
    T = x_ref.shape[0] // B

    # Hoisted input projection: ONE matmul + ONE bias broadcast for all steps.
    xw = (jnp.dot(x_ref[...], wih_ref[...], preferred_element_type=jnp.float32)
          + b_ref[...])                                   # (T*B, 4H)

    whh = whh_ref[...]                                    # (H, 4H), loaded once
    h = h0_ref[...]                                       # (B, H)
    c = c0_ref[...]                                       # (B, H)

    # T is small & static -> fully unrolled loop with static (sublane-aligned)
    # slice offsets; only h @ W_hh + gate nonlinearities are serial.
    # TODO(synk): for large T switch to lax.fori_loop(..., unroll=k) to bound
    # register live ranges.
    for t in range(T):
        gates = xw[t * B:(t + 1) * B, :] + jnp.dot(
            h, whh, preferred_element_type=jnp.float32)   # (B, 4H)
        # PyTorch gate order: i, f, g, o  (4H = 128 -> one vreg at H=32).
        i_g = jax.nn.sigmoid(gates[:, 0 * H:1 * H])
        f_g = jax.nn.sigmoid(gates[:, 1 * H:2 * H])
        g_g = jnp.tanh(gates[:, 2 * H:3 * H])
        o_g = jax.nn.sigmoid(gates[:, 3 * H:4 * H])
        c = f_g * c + i_g * g_g
        h = o_g * jnp.tanh(c)

    hn_ref[...] = h
    cn_ref[...] = c

    # Fused MLP head on the still-resident hn: fc(relu(fc_1(hn))).
    hid = jnp.maximum(
        jnp.dot(h, w1_ref[...], preferred_element_type=jnp.float32) + b1_ref[...],
        0.0)
    out = jnp.dot(hid, w2_ref[...], preferred_element_type=jnp.float32) + b2_ref[...]
    out_ref[...] = out.astype(out_ref.dtype)


def lstm_s_forward(params, x, h0, c0):
    """Reproduces LSTM_S.forward: returns (output_hn, hn, cn).

    x : (T, B, In)   h0, c0 : (1, B, H)
    """
    T, B, In = x.shape
    H = h0.shape[-1]

    # Pad batch up to the 8-sublane width (free in wall time; sliced off after).
    Bp = ((B + 7) // 8) * 8
    pad = Bp - B
    h0_2d = h0.reshape(B, H)
    c0_2d = c0.reshape(B, H)
    if pad:
        x_p = jnp.pad(x, ((0, 0), (0, pad), (0, 0)))
        h0_2d = jnp.pad(h0_2d, ((0, pad), (0, 0)))
        c0_2d = jnp.pad(c0_2d, ((0, pad), (0, 0)))
    else:
        x_p = x
    x2d = x_p.reshape(T * Bp, In)                # row-major: rows [t*Bp,(t+1)*Bp) = step t

    wih_t = params["w_ih"].T                     # (In, 4H)
    whh_t = params["w_hh"].T                     # (H, 4H)
    b = (params["b_ih"] + params["b_hh"]).reshape(1, 4 * H)
    w1_t = params["fc1_w"].T                     # (H, 128)
    b1 = params["fc1_b"].reshape(1, -1)          # (1, 128)
    w2_t = params["fc_w"].T                      # (128, Out)
    b2 = params["fc_b"].reshape(1, -1)           # (1, Out)
    Out = w2_t.shape[1]

    full = lambda shape: pl.BlockSpec(shape, lambda: tuple(0 for _ in shape))

    output_hn, hn, cn = pl.pallas_call(
        lstm_s_kernel,
        out_shape=(jax.ShapeDtypeStruct((Bp, Out), jnp.float32),
                   jax.ShapeDtypeStruct((Bp, H), jnp.float32),
                   jax.ShapeDtypeStruct((Bp, H), jnp.float32)),
        grid=(),
        in_specs=[full((T * Bp, In)),            # x projected rows
                  full((Bp, H)), full((Bp, H)),  # h0, c0
                  full((In, 4 * H)), full((H, 4 * H)), full((1, 4 * H)),
                  full((H, 128)), full((1, 128)),
                  full((128, Out)), full((1, Out))],
        out_specs=(full((Bp, Out)), full((Bp, H)), full((Bp, H))),
    )(x2d, h0_2d, c0_2d, wih_t, whh_t, b, w1_t, b1, w2_t, b2)

    # restore PyTorch shapes: output_hn (1, B, Out), hn/cn (1, B, H)
    return (output_hn[:B].reshape(1, B, Out),
            hn[:B].reshape(1, B, H),
            cn[:B].reshape(1, B, H))


def init_params(key, input_size, hidden_size, output_size):
    ks = jax.random.split(key, 8)
    k_lstm = 1.0 / jnp.sqrt(hidden_size)
    k_fc1 = 1.0 / jnp.sqrt(hidden_size)
    k_fc = 1.0 / jnp.sqrt(128.0)
    u = lambda k, shape, lim: jax.random.uniform(
        k, shape, jnp.float32, minval=-lim, maxval=lim)
    return {
        "w_ih": u(ks[0], (4 * hidden_size, input_size), k_lstm),
        "w_hh": u(ks[1], (4 * hidden_size, hidden_size), k_lstm),
        "b_ih": u(ks[2], (4 * hidden_size,), k_lstm),
        "b_hh": u(ks[3], (4 * hidden_size,), k_lstm),
        "fc1_w": u(ks[4], (128, hidden_size), k_fc1),
        "fc1_b": u(ks[5], (128,), k_fc1),
        "fc_w": u(ks[6], (output_size, 128), k_fc),
        "fc_b": u(ks[7], (output_size,), k_fc),
    }


def _reference(params, x, h0, c0):
    """Pure-JAX reference of the same forward for a sanity check."""
    T, B, In = x.shape
    H = h0.shape[-1]
    h, c = h0.reshape(B, H), c0.reshape(B, H)
    for t in range(T):
        g = x[t] @ params["w_ih"].T + h @ params["w_hh"].T + params["b_ih"] + params["b_hh"]
        i, f, gg, o = (jax.nn.sigmoid(g[:, :H]), jax.nn.sigmoid(g[:, H:2*H]),
                       jnp.tanh(g[:, 2*H:3*H]), jax.nn.sigmoid(g[:, 3*H:]))
        c = f * c + i * gg
        h = o * jnp.tanh(c)
    out = jnp.maximum(h @ params["fc1_w"].T + params["fc1_b"], 0.0)
    out = out @ params["fc_w"].T + params["fc_b"]
    return out.reshape(1, B, -1), h.reshape(1, B, H), c.reshape(1, B, H)


if __name__ == "__main__":
    input_size, hidden_size, output_size = 16, 32, 8
    seq_len, batch = 8, 2

    key = jax.random.PRNGKey(0)
    kx, kh, kc, kp = jax.random.split(key, 4)
    params = init_params(kp, input_size, hidden_size, output_size)

    x = jax.random.normal(kx, (seq_len, batch, input_size), jnp.float32)
    h0 = jax.random.normal(kh, (1, batch, hidden_size), jnp.float32)
    c0 = jax.random.normal(kc, (1, batch, hidden_size), jnp.float32)

    output_hn, hn, cn = jax.block_until_ready(lstm_s_forward(params, x, h0, c0))

    ref_out, ref_hn, ref_cn = _reference(params, x, h0, c0)
    assert jnp.allclose(output_hn, ref_out, atol=1e-4, rtol=1e-4)
    assert jnp.allclose(hn, ref_hn, atol=1e-4, rtol=1e-4)
    assert jnp.allclose(cn, ref_cn, atol=1e-4, rtol=1e-4)

    print("KERNEL_OK")
</pallas_src>

<mosaic_0001>
module attributes {stable_mosaic.version = 11 : i64} {
  func.func @lstm_s_kernel(%arg0: memref<64x16xf32, #tpu.memory_space<vmem>>, %arg1: memref<8x32xf32, #tpu.memory_space<vmem>>, %arg2: memref<8x32xf32, #tpu.memory_space<vmem>>, %arg3: memref<16x128xf32, #tpu.memory_space<vmem>>, %arg4: memref<32x128xf32, #tpu.memory_space<vmem>>, %arg5: memref<1x128xf32, #tpu.memory_space<vmem>>, %arg6: memref<32x128xf32, #tpu.memory_space<vmem>>, %arg7: memref<1x128xf32, #tpu.memory_space<vmem>>, %arg8: memref<128x8xf32, #tpu.memory_space<vmem>>, %arg9: memref<1x8xf32, #tpu.memory_space<vmem>>, %arg10: memref<8x8xf32, #tpu.memory_space<vmem>>, %arg11: memref<8x32xf32, #tpu.memory_space<vmem>>, %arg12: memref<8x32xf32, #tpu.memory_space<vmem>>) attributes {dimension_semantics = [], scalar_prefetch = 0 : i64, scratch_operands = 0 : i64, tpu.core_type = #tpu.core_type<tc>} {
    %c0 = arith.constant 0 : index
    %c0_0 = arith.constant 0 : index
    %0 = vector.load %arg0[%c0, %c0_0] : memref<64x16xf32, #tpu.memory_space<vmem>>, vector<64x16xf32>
    %c0_1 = arith.constant 0 : index
    %c0_2 = arith.constant 0 : index
    %1 = vector.load %arg3[%c0_1, %c0_2] : memref<16x128xf32, #tpu.memory_space<vmem>>, vector<16x128xf32>
    %cst = arith.constant dense<0.000000e+00> : vector<64x128xf32>
    %2 = tpu.matmul %0, %1, %cst {dimension_numbers = #tpu.dot_dimension_numbers<[1], [0], [0], [1], [0, 0, 1, 1], [], []>} : vector<64x16xf32>, vector<16x128xf32>, vector<64x128xf32> -> vector<64x128xf32>
    %c0_3 = arith.constant 0 : index
    %c0_4 = arith.constant 0 : index
    %3 = vector.load %arg5[%c0_3, %c0_4] : memref<1x128xf32, #tpu.memory_space<vmem>>, vector<1x128xf32>
    %4 = vector.broadcast %3 : vector<1x128xf32> to vector<64x128xf32>
    %5 = arith.addf %2, %4 : vector<64x128xf32>
    %c0_5 = arith.constant 0 : index
    %c0_6 = arith.constant 0 : index
    %6 = vector.load %arg4[%c0_5, %c0_6] : memref<32x128xf32, #tpu.memory_space<vmem>>, vector<32x128xf32>
    %c0_7 = arith.constant 0 : index
    %c0_8 = arith.constant 0 : index
    %7 = vector.load %arg1[%c0_7, %c0_8] : memref<8x32xf32, #tpu.memory_space<vmem>>, vector<8x32xf32>
    %c0_9 = arith.constant 0 : index
    %c0_10 = arith.constant 0 : index
    %8 = vector.load %arg2[%c0_9, %c0_10] : memref<8x32xf32, #tpu.memory_space<vmem>>, vector<8x32xf32>
    %9 = vector.extract_strided_slice %5 {offsets = [0, 0], sizes = [8, 128], strides = [1, 1]} : vector<64x128xf32> to vector<8x128xf32>
    %cst_11 = arith.constant dense<0.000000e+00> : vector<8x128xf32>
    %10 = tpu.matmul %7, %6, %cst_11 {dimension_numbers = #tpu.dot_dimension_numbers<[1], [0], [0], [1], [0, 0, 1, 1], [], []>} : vector<8x32xf32>, vector<32x128xf32>, vector<8x128xf32> -> vector<8x128xf32>
    %11 = arith.addf %9, %10 : vector<8x128xf32>
    %12 = vector.extract_strided_slice %11 {offsets = [0, 0], sizes = [8, 32], strides = [1, 1]} : vector<8x128xf32> to vector<8x32xf32>
    %13 = arith.negf %12 : vector<8x32xf32>
    %14 = math.exp %13 : vector<8x32xf32>
    %cst_12 = arith.constant 1.000000e+00 : f32
    %15 = vector.broadcast %cst_12 : f32 to vector<8x32xf32>
    %16 = arith.addf %15, %14 : vector<8x32xf32>
    %17 = arith.divf %15, %16 : vector<8x32xf32>
    %18 = vector.extract_strided_slice %11 {offsets = [0, 32], sizes = [8, 32], strides = [1, 1]} : vector<8x128xf32> to vector<8x32xf32>
    %19 = arith.negf %18 : vector<8x32xf32>
    %20 = math.exp %19 : vector<8x32xf32>
    %cst_13 = arith.constant 1.000000e+00 : f32
    %21 = vector.broadcast %cst_13 : f32 to vector<8x32xf32>
    %22 = arith.addf %21, %20 : vector<8x32xf32>
    %23 = arith.divf %21, %22 : vector<8x32xf32>
    %24 = vector.extract_strided_slice %11 {offsets = [0, 64], sizes = [8, 32], strides = [1, 1]} : vector<8x128xf32> to vector<8x32xf32>
    %25 = math.tanh %24 : vector<8x32xf32>
    %26 = vector.extract_strided_slice %11 {offsets = [0, 96], sizes = [8, 32], strides = [1, 1]} : vector<8x128xf32> to vector<8x32xf32>
    %27 = arith.negf %26 : vector<8x32xf32>
    %28 = math.exp %27 : vector<8x32xf32>
    %cst_14 = arith.constant 1.000000e+00 : f32
    %29 = vector.broadcast %cst_14 : f32 to vector<8x32xf32>
    %30 = arith.addf %29, %28 : vector<8x32xf32>
    %31 = arith.divf %29, %30 : vector<8x32xf32>
    %32 = arith.mulf %23, %8 : vector<8x32xf32>
    %33 = arith.mulf %17, %25 : vector<8x32xf32>
    %34 = arith.addf %32, %33 : vector<8x32xf32>
    %35 = math.tanh %34 : vector<8x32xf32>
    %36 = arith.mulf %31, %35 : vector<8x32xf32>
    %37 = vector.extract_strided_slice %5 {offsets = [8, 0], sizes = [8, 128], strides = [1, 1]} : vector<64x128xf32> to vector<8x128xf32>
    %cst_15 = arith.constant dense<0.000000e+00> : vector<8x128xf32>
    %38 = tpu.matmul %36, %6, %cst_15 {dimension_numbers = #tpu.dot_dimension_numbers<[1], [0], [0], [1], [0, 0, 1, 1], [], []>} : vector<8x32xf32>, vector<32x128xf32>, vector<8x128xf32> -> vector<8x128xf32>
    %39 = arith.addf %37, %38 : vector<8x128xf32>
    %40 = vector.extract_strided_slice %39 {offsets = [0, 0], sizes = [8, 32], strides = [1, 1]} : vector<8x128xf32> to vector<8x32xf32>
    %41 = arith.negf %40 : vector<8x32xf32>
    %42 = math.exp %41 : vector<8x32xf32>
    %cst_16 = arith.constant 1.000000e+00 : f32
    %43 = vector.broadcast %cst_16 : f32 to vector<8x32xf32>
    %44 = arith.addf %43, %42 : vector<8x32xf32>
    %45 = arith.divf %43, %44 : vector<8x32xf32>
    %46 = vector.extract_strided_slice %39 {offsets = [0, 32], sizes = [8, 32], strides = [1, 1]} : vector<8x128xf32> to vector<8x32xf32>
    %47 = arith.negf %46 : vector<8x32xf32>
    %48 = math.exp %47 : vector<8x32xf32>
    %cst_17 = arith.constant 1.000000e+00 : f32
    %49 = vector.broadcast %cst_17 : f32 to vector<8x32xf32>
    %50 = arith.addf %49, %48 : vector<8x32xf32>
    %51 = arith.divf %49, %50 : vector<8x32xf32>
    %52 = vector.extract_strided_slice %39 {offsets = [0, 64], sizes = [8, 32], strides = [1, 1]} : vector<8x128xf32> to vector<8x32xf32>
    %53 = math.tanh %52 : vector<8x32xf32>
    %54 = vector.extract_strided_slice %39 {offsets = [0, 96], sizes = [8, 32], strides = [1, 1]} : vector<8x128xf32> to vector<8x32xf32>
    %55 = arith.negf %54 : vector<8x32xf32>
    %56 = math.exp %55 : vector<8x32xf32>
    %cst_18 = arith.constant 1.000000e+00 : f32
    %57 = vector.broadcast %cst_18 : f32 to vector<8x32xf32>
    %58 = arith.addf %57, %56 : vector<8x32xf32>
    %59 = arith.divf %57, %58 : vector<8x32xf32>
    %60 = arith.mulf %51, %34 : vector<8x32xf32>
    %61 = arith.mulf %45, %53 : vector<8x32xf32>
    %62 = arith.addf %60, %61 : vector<8x32xf32>
    %63 = math.tanh %62 : vector<8x32xf32>
    %64 = arith.mulf %59, %63 : vector<8x32xf32>
    %65 = vector.extract_strided_slice %5 {offsets = [16, 0], sizes = [8, 128], strides = [1, 1]} : vector<64x128xf32> to vector<8x128xf32>
    %cst_19 = arith.constant dense<0.000000e+00> : vector<8x128xf32>
    %66 = tpu.matmul %64, %6, %cst_19 {dimension_numbers = #tpu.dot_dimension_numbers<[1], [0], [0], [1], [0, 0, 1, 1], [], []>} : vector<8x32xf32>, vector<32x128xf32>, vector<8x128xf32> -> vector<8x128xf32>
    %67 = arith.addf %65, %66 : vector<8x128xf32>
    %68 = vector.extract_strided_slice %67 {offsets = [0, 0], sizes = [8, 32], strides = [1, 1]} : vector<8x128xf32> to vector<8x32xf32>
    %69 = arith.negf %68 : vector<8x32xf32>
    %70 = math.exp %69 : vector<8x32xf32>
    %cst_20 = arith.constant 1.000000e+00 : f32
    %71 = vector.broadcast %cst_20 : f32 to vector<8x32xf32>
    %72 = arith.addf %71, %70 : vector<8x32xf32>
    %73 = arith.divf %71, %72 : vector<8x32xf32>
    %74 = vector.extract_strided_slice %67 {offsets = [0, 32], sizes = [8, 32], strides = [1, 1]} : vector<8x128xf32> to vector<8x32xf32>
    %75 = arith.negf %74 : vector<8x32xf32>
    %76 = math.exp %75 : vector<8x32xf32>
    %cst_21 = arith.constant 1.000000e+00 : f32
    %77 = vector.broadcast %cst_21 : f32 to vector<8x32xf32>
    %78 = arith.addf %77, %76 : vector<8x32xf32>
    %79 = arith.divf %77, %78 : vector<8x32xf32>
    %80 = vector.extract_strided_slice %67 {offsets = [0, 64], sizes = [8, 32], strides = [1, 1]} : vector<8x128xf32> to vector<8x32xf32>
    %81 = math.tanh %80 : vector<8x32xf32>
    %82 = vector.extract_strided_slice %67 {offsets = [0, 96], sizes = [8, 32], strides = [1, 1]} : vector<8x128xf32> to vector<8x32xf32>
    %83 = arith.negf %82 : vector<8x32xf32>
    %84 = math.exp %83 : vector<8x32xf32>
    %cst_22 = arith.constant 1.000000e+00 : f32
    %85 = vector.broadcast %cst_22 : f32 to vector<8x32xf32>
    %86 = arith.addf %85, %84 : vector<8x32xf32>
    %87 = arith.divf %85, %86 : vector<8x32xf32>
    %88 = arith.mulf %79, %62 : vector<8x32xf32>
    %89 = arith.mulf %73, %81 : vector<8x32xf32>
    %90 = arith.addf %88, %89 : vector<8x32xf32>
    %91 = math.tanh %90 : vector<8x32xf32>
    %92 = arith.mulf %87, %91 : vector<8x32xf32>
    %93 = vector.extract_strided_slice %5 {offsets = [24, 0], sizes = [8, 128], strides = [1, 1]} : vector<64x128xf32> to vector<8x128xf32>
    %cst_23 = arith.constant dense<0.000000e+00> : vector<8x128xf32>
    %94 = tpu.matmul %92, %6, %cst_23 {dimension_numbers = #tpu.dot_dimension_numbers<[1], [0], [0], [1], [0, 0, 1, 1], [], []>} : vector<8x32xf32>, vector<32x128xf32>, vector<8x128xf32> -> vector<8x128xf32>
    %95 = arith.addf %93, %94 : vector<8x128xf32>
    %96 = vector.extract_strided_slice %95 {offsets = [0, 0], sizes = [8, 32], strides = [1, 1]} : vector<8x128xf32> to vector<8x32xf32>
    %97 = arith.negf %96 : vector<8x32xf32>
    %98 = math.exp %97 : vector<8x32xf32>
    %cst_24 = arith.constant 1.000000e+00 : f32
    %99 = vector.broadcast %cst_24 : f32 to vector<8x32xf32>
    %100 = arith.addf %99, %98 : vector<8x32xf32>
    %101 = arith.divf %99, %100 : vector<8x32xf32>
    %102 = vector.extract_strided_slice %95 {offsets = [0, 32], sizes = [8, 32], strides = [1, 1]} : vector<8x128xf32> to vector<8x32xf32>
    %103 = arith.negf %102 : vector<8x32xf32>
    %104 = math.exp %103 : vector<8x32xf32>
    %cst_25 = arith.constant 1.000000e+00 : f32
    %105 = vector.broadcast %cst_25 : f32 to vector<8x32xf32>
    %106 = arith.addf %105, %104 : vector<8x32xf32>
    %107 = arith.divf %105, %106 : vector<8x32xf32>
    %108 = vector.extract_strided_slice %95 {offsets = [0, 64], sizes = [8, 32], strides = [1, 1]} : vector<8x128xf32> to vector<8x32xf32>
    %109 = math.tanh %108 : vector<8x32xf32>
    %110 = vector.extract_strided_slice %95 {offsets = [0, 96], sizes = [8, 32], strides = [1, 1]} : vector<8x128xf32> to vector<8x32xf32>
    %111 = arith.negf %110 : vector<8x32xf32>
    %112 = math.exp %111 : vector<8x32xf32>
    %cst_26 = arith.constant 1.000000e+00 : f32
    %113 = vector.broadcast %cst_26 : f32 to vector<8x32xf32>
    %114 = arith.addf %113, %112 : vector<8x32xf32>
    %115 = arith.divf %113, %114 : vector<8x32xf32>
    %116 = arith.mulf %107, %90 : vector<8x32xf32>
    %117 = arith.mulf %101, %109 : vector<8x32xf32>
    %118 = arith.addf %116, %117 : vector<8x32xf32>
    %119 = math.tanh %118 : vector<8x32xf32>
    %120 = arith.mulf %115, %119 : vector<8x32xf32>
    %121 = vector.extract_strided_slice %5 {offsets = [32, 0], sizes = [8, 128], strides = [1, 1]} : vector<64x128xf32> to vector<8x128xf32>
    %cst_27 = arith.constant dense<0.000000e+00> : vector<8x128xf32>
    %122 = tpu.matmul %120, %6, %cst_27 {dimension_numbers = #tpu.dot_dimension_numbers<[1], [0], [0], [1], [0, 0, 1, 1], [], []>} : vector<8x32xf32>, vector<32x128xf32>, vector<8x128xf32> -> vector<8x128xf32>
    %123 = arith.addf %121, %122 : vector<8x128xf32>
    %124 = vector.extract_strided_slice %123 {offsets = [0, 0], sizes = [8, 32], strides = [1, 1]} : vector<8x128xf32> to vector<8x32xf32>
    %125 = arith.negf %124 : vector<8x32xf32>
    %126 = math.exp %125 : vector<8x32xf32>
    %cst_28 = arith.constant 1.000000e+00 : f32
    %127 = vector.broadcast %cst_28 : f32 to vector<8x32xf32>
    %128 = arith.addf %127, %126 : vector<8x32xf32>
    %129 = arith.divf %127, %128 : vector<8x32xf32>
    %130 = vector.extract_strided_slice %123 {offsets = [0, 32], sizes = [8, 32], strides = [1, 1]} : vector<8x128xf32> to vector<8x32xf32>
    %131 = arith.negf %130 : vector<8x32xf32>
    %132 = math.exp %131 : vector<8x32xf32>
    %cst_29 = arith.constant 1.000000e+00 : f32
    %133 = vector.broadcast %cst_29 : f32 to vector<8x32xf32>
    %134 = arith.addf %133, %132 : vector<8x32xf32>
    %135 = arith.divf %133, %134 : vector<8x32xf32>
    %136 = vector.extract_strided_slice %123 {offsets = [0, 64], sizes = [8, 32], strides = [1, 1]} : vector<8x128xf32> to vector<8x32xf32>
    %137 = math.tanh %136 : vector<8x32xf32>
    %138 = vector.extract_strided_slice %123 {offsets = [0, 96], sizes = [8, 32], strides = [1, 1]} : vector<8x128xf32> to vector<8x32xf32>
    %139 = arith.negf %138 : vector<8x32xf32>
    %140 = math.exp %139 : vector<8x32xf32>
    %cst_30 = arith.constant 1.000000e+00 : f32
    %141 = vector.broadcast %cst_30 : f32 to vector<8x32xf32>
    %142 = arith.addf %141, %140 : vector<8x32xf32>
    %143 = arith.divf %141, %142 : vector<8x32xf32>
    %144 = arith.mulf %135, %118 : vector<8x32xf32>
    %145 = arith.mulf %129, %137 : vector<8x32xf32>
    %146 = arith.addf %144, %145 : vector<8x32xf32>
    %147 = math.tanh %146 : vector<8x32xf32>
    %148 = arith.mulf %143, %147 : vector<8x32xf32>
    %149 = vector.extract_strided_slice %5 {offsets = [40, 0], sizes = [8, 128], strides = [1, 1]} : vector<64x128xf32> to vector<8x128xf32>
    %cst_31 = arith.constant dense<0.000000e+00> : vector<8x128xf32>
    %150 = tpu.matmul %148, %6, %cst_31 {dimension_numbers = #tpu.dot_dimension_numbers<[1], [0], [0], [1], [0, 0, 1, 1], [], []>} : vector<8x32xf32>, vector<32x128xf32>, vector<8x128xf32> -> vector<8x128xf32>
    %151 = arith.addf %149, %150 : vector<8x128xf32>
    %152 = vector.extract_strided_slice %151 {offsets = [0, 0], sizes = [8, 32], strides = [1, 1]} : vector<8x128xf32> to vector<8x32xf32>
    %153 = arith.negf %152 : vector<8x32xf32>
    %154 = math.exp %153 : vector<8x32xf32>
    %cst_32 = arith.constant 1.000000e+00 : f32
    %155 = vector.broadcast %cst_32 : f32 to vector<8x32xf32>
    %156 = arith.addf %155, %154 : vector<8x32xf32>
    %157 = arith.divf %155, %156 : vector<8x32xf32>
    %158 = vector.extract_strided_slice %151 {offsets = [0, 32], sizes = [8, 32], strides = [1, 1]} : vector<8x128xf32> to vector<8x32xf32>
    %159 = arith.negf %158 : vector<8x32xf32>
    %160 = math.exp %159 : vector<8x32xf32>
    %cst_33 = arith.constant 1.000000e+00 : f32
    %161 = vector.broadcast %cst_33 : f32 to vector<8x32xf32>
    %162 = arith.addf %161, %160 : vector<8x32xf32>
    %163 = arith.divf %161, %162 : vector<8x32xf32>
    %164 = vector.extract_strided_slice %151 {offsets = [0, 64], sizes = [8, 32], strides = [1, 1]} : vector<8x128xf32> to vector<8x32xf32>
    %165 = math.tanh %164 : vector<8x32xf32>
    %166 = vector.extract_strided_slice %151 {offsets = [0, 96], sizes = [8, 32], strides = [1, 1]} : vector<8x128xf32> to vector<8x32xf32>
    %167 = arith.negf %166 : vector<8x32xf32>
    %168 = math.exp %167 : vector<8x32xf32>
    %cst_34 = arith.constant 1.000000e+00 : f32
    %169 = vector.broadcast %cst_34 : f32 to vector<8x32xf32>
    %170 = arith.addf %169, %168 : vector<8x32xf32>
    %171 = arith.divf %169, %170 : vector<8x32xf32>
    %172 = arith.mulf %163, %146 : vector<8x32xf32>
    %173 = arith.mulf %157, %165 : vector<8x32xf32>
    %174 = arith.addf %172, %173 : vector<8x32xf32>
    %175 = math.tanh %174 : vector<8x32xf32>
    %176 = arith.mulf %171, %175 : vector<8x32xf32>
    %177 = vector.extract_strided_slice %5 {offsets = [48, 0], sizes = [8, 128], strides = [1, 1]} : vector<64x128xf32> to vector<8x128xf32>
    %cst_35 = arith.constant dense<0.000000e+00> : vector<8x128xf32>
    %178 = tpu.matmul %176, %6, %cst_35 {dimension_numbers = #tpu.dot_dimension_numbers<[1], [0], [0], [1], [0, 0, 1, 1], [], []>} : vector<8x32xf32>, vector<32x128xf32>, vector<8x128xf32> -> vector<8x128xf32>
    %179 = arith.addf %177, %178 : vector<8x128xf32>
    %180 = vector.extract_strided_slice %179 {offsets = [0, 0], sizes = [8, 32], strides = [1, 1]} : vector<8x128xf32> to vector<8x32xf32>
    %181 = arith.negf %180 : vector<8x32xf32>
    %182 = math.exp %181 : vector<8x32xf32>
    %cst_36 = arith.constant 1.000000e+00 : f32
    %183 = vector.broadcast %cst_36 : f32 to vector<8x32xf32>
    %184 = arith.addf %183, %182 : vector<8x32xf32>
    %185 = arith.divf %183, %184 : vector<8x32xf32>
    %186 = vector.extract_strided_slice %179 {offsets = [0, 32], sizes = [8, 32], strides = [1, 1]} : vector<8x128xf32> to vector<8x32xf32>
    %187 = arith.negf %186 : vector<8x32xf32>
    %188 = math.exp %187 : vector<8x32xf32>
    %cst_37 = arith.constant 1.000000e+00 : f32
    %189 = vector.broadcast %cst_37 : f32 to vector<8x32xf32>
    %190 = arith.addf %189, %188 : vector<8x32xf32>
    %191 = arith.divf %189, %190 : vector<8x32xf32>
    %192 = vector.extract_strided_slice %179 {offsets = [0, 64], sizes = [8, 32], strides = [1, 1]} : vector<8x128xf32> to vector<8x32xf32>
    %193 = math.tanh %192 : vector<8x32xf32>
    %194 = vector.extract_strided_slice %179 {offsets = [0, 96], sizes = [8, 32], strides = [1, 1]} : vector<8x128xf32> to vector<8x32xf32>
    %195 = arith.negf %194 : vector<8x32xf32>
    %196 = math.exp %195 : vector<8x32xf32>
    %cst_38 = arith.constant 1.000000e+00 : f32
    %197 = vector.broadcast %cst_38 : f32 to vector<8x32xf32>
    %198 = arith.addf %197, %196 : vector<8x32xf32>
    %199 = arith.divf %197, %198 : vector<8x32xf32>
    %200 = arith.mulf %191, %174 : vector<8x32xf32>
    %201 = arith.mulf %185, %193 : vector<8x32xf32>
    %202 = arith.addf %200, %201 : vector<8x32xf32>
    %203 = math.tanh %202 : vector<8x32xf32>
    %204 = arith.mulf %199, %203 : vector<8x32xf32>
    %205 = vector.extract_strided_slice %5 {offsets = [56, 0], sizes = [8, 128], strides = [1, 1]} : vector<64x128xf32> to vector<8x128xf32>
    %cst_39 = arith.constant dense<0.000000e+00> : vector<8x128xf32>
    %206 = tpu.matmul %204, %6, %cst_39 {dimension_numbers = #tpu.dot_dimension_numbers<[1], [0], [0], [1], [0, 0, 1, 1], [], []>} : vector<8x32xf32>, vector<32x128xf32>, vector<8x128xf32> -> vector<8x128xf32>
    %207 = arith.addf %205, %206 : vector<8x128xf32>
    %208 = vector.extract_strided_slice %207 {offsets = [0, 0], sizes = [8, 32], strides = [1, 1]} : vector<8x128xf32> to vector<8x32xf32>
    %209 = arith.negf %208 : vector<8x32xf32>
    %210 = math.exp %209 : vector<8x32xf32>
    %cst_40 = arith.constant 1.000000e+00 : f32
    %211 = vector.broadcast %cst_40 : f32 to vector<8x32xf32>
    %212 = arith.addf %211, %210 : vector<8x32xf32>
    %213 = arith.divf %211, %212 : vector<8x32xf32>
    %214 = vector.extract_strided_slice %207 {offsets = [0, 32], sizes = [8, 32], strides = [1, 1]} : vector<8x128xf32> to vector<8x32xf32>
    %215 = arith.negf %214 : vector<8x32xf32>
    %216 = math.exp %215 : vector<8x32xf32>
    %cst_41 = arith.constant 1.000000e+00 : f32
    %217 = vector.broadcast %cst_41 : f32 to vector<8x32xf32>
    %218 = arith.addf %217, %216 : vector<8x32xf32>
    %219 = arith.divf %217, %218 : vector<8x32xf32>
    %220 = vector.extract_strided_slice %207 {offsets = [0, 64], sizes = [8, 32], strides = [1, 1]} : vector<8x128xf32> to vector<8x32xf32>
    %221 = math.tanh %220 : vector<8x32xf32>
    %222 = vector.extract_strided_slice %207 {offsets = [0, 96], sizes = [8, 32], strides = [1, 1]} : vector<8x128xf32> to vector<8x32xf32>
    %223 = arith.negf %222 : vector<8x32xf32>
    %224 = math.exp %223 : vector<8x32xf32>
    %cst_42 = arith.constant 1.000000e+00 : f32
    %225 = vector.broadcast %cst_42 : f32 to vector<8x32xf32>
    %226 = arith.addf %225, %224 : vector<8x32xf32>
    %227 = arith.divf %225, %226 : vector<8x32xf32>
    %228 = arith.mulf %219, %202 : vector<8x32xf32>
    %229 = arith.mulf %213, %221 : vector<8x32xf32>
    %230 = arith.addf %228, %229 : vector<8x32xf32>
    %231 = math.tanh %230 : vector<8x32xf32>
    %232 = arith.mulf %227, %231 : vector<8x32xf32>
    %c0_43 = arith.constant 0 : index
    %c0_44 = arith.constant 0 : index
    %233 = vector.load %arg11[%c0_43, %c0_44] : memref<8x32xf32, #tpu.memory_space<vmem>>, vector<8x32xf32>
    tpu.vector_store %arg11[%c0_43, %c0_44], %232 {strides = array<i32>} : memref<8x32xf32, #tpu.memory_space<vmem>>, vector<8x32xf32>,
    %c0_45 = arith.constant 0 : index
    %c0_46 = arith.constant 0 : index
    %234 = vector.load %arg12[%c0_45, %c0_46] : memref<8x32xf32, #tpu.memory_space<vmem>>, vector<8x32xf32>
    tpu.vector_store %arg12[%c0_45, %c0_46], %230 {strides = array<i32>} : memref<8x32xf32, #tpu.memory_space<vmem>>, vector<8x32xf32>,
    %c0_47 = arith.constant 0 : index
    %c0_48 = arith.constant 0 : index
    %235 = vector.load %arg6[%c0_47, %c0_48] : memref<32x128xf32, #tpu.memory_space<vmem>>, vector<32x128xf32>
    %cst_49 = arith.constant dense<0.000000e+00> : vector<8x128xf32>
    %236 = tpu.matmul %232, %235, %cst_49 {dimension_numbers = #tpu.dot_dimension_numbers<[1], [0], [0], [1], [0, 0, 1, 1], [], []>} : vector<8x32xf32>, vector<32x128xf32>, vector<8x128xf32> -> vector<8x128xf32>
    %c0_50 = arith.constant 0 : index
    %c0_51 = arith.constant 0 : index
    %237 = vector.load %arg7[%c0_50, %c0_51] : memref<1x128xf32, #tpu.memory_space<vmem>>, vector<1x128xf32>
    %238 = vector.broadcast %237 : vector<1x128xf32> to vector<8x128xf32>
    %239 = arith.addf %236, %238 : vector<8x128xf32>
    %cst_52 = arith.constant 0.000000e+00 : f32
    %240 = vector.broadcast %cst_52 : f32 to vector<8x128xf32>
    %241 = arith.maximumf %239, %240 : vector<8x128xf32>
    %c0_53 = arith.constant 0 : index
    %c0_54 = arith.constant 0 : index
    %242 = vector.load %arg8[%c0_53, %c0_54] : memref<128x8xf32, #tpu.memory_space<vmem>>, vector<128x8xf32>
    %cst_55 = arith.constant dense<0.000000e+00> : vector<8x8xf32>
    %243 = tpu.matmul %241, %242, %cst_55 {dimension_numbers = #tpu.dot_dimension_numbers<[1], [0], [0], [1], [0, 0, 1, 1], [], []>} : vector<8x128xf32>, vector<128x8xf32>, vector<8x8xf32> -> vector<8x8xf32>
    %c0_56 = arith.constant 0 : index
    %c0_57 = arith.constant 0 : index
    %244 = vector.load %arg9[%c0_56, %c0_57] : memref<1x8xf32, #tpu.memory_space<vmem>>, vector<1x8xf32>
    %245 = vector.broadcast %244 : vector<1x8xf32> to vector<8x8xf32>
    %246 = arith.addf %243, %245 : vector<8x8xf32>
    %c0_58 = arith.constant 0 : index
    %c0_59 = arith.constant 0 : index
    %247 = vector.load %arg10[%c0_58, %c0_59] : memref<8x8xf32, #tpu.memory_space<vmem>>, vector<8x8xf32>
    tpu.vector_store %arg10[%c0_58, %c0_59], %246 {strides = array<i32>} : memref<8x8xf32, #tpu.memory_space<vmem>>, vector<8x8xf32>,
    return
  }
}

</mosaic_0001>

<bundles_post_ra>
// kernel: tpu_custom_call.1
= control target key start
LH: loop header
LB: loop body
LE: loop exit
PB: predicated region body
PF: predicated region fallthrough
CT: control target
= control target key end

     0   :  { %18 = vsyncpa [#allocation3], 0  ;;  %vm57_vm0 = vcmask 130048   ;;  %v1701_v6 = vmov 0.0|0.0   ;;  %vm1702_vm1 = vmmov 0   ;;  %v1703_v8 = vmov 0.0   ;;  %s2064_s0 = inlined_call_operand.vmem [shape: f32[64,16], index: 0, kind: input, shape index: {}]   ;;  %s2065_s1 = inlined_call_operand.vmem [shape: f32[8,32], index: 1, kind: input, shape index: {}]   ;;  %s2066_s2 = inlined_call_operand.vmem [shape: f32[8,32], index: 2, kind: input, shape index: {}]   ;;  %s2067_s3 = inlined_call_operand.vmem [shape: f32[16,128], index: 3, kind: input, shape index: {}]   ;;  %s2068_s4 = inlined_call_operand.vmem [shape: f32[32,128], index: 4, kind: input, shape index: {}]   ;;  %s2069_s5 = inlined_call_operand.vmem [shape: f32[1,128], index: 5, kind: input, shape index: {}]   ;;  %s2070_s6 = inlined_call_operand.vmem [shape: f32[32,128], index: 6, kind: input, shape index: {}]   ;;  %s2071_s7 = inlined_call_operand.vmem [shape: f32[1,128], index: 7, kind: input, shape index: {}]   ;;  %s2072_s8 = inlined_call_operand.vmem [shape: f32[128,8], index: 8, kind: input, shape index: {}]   ;;  %s2073_s9 = inlined_call_operand.vmem [shape: f32[1,8], index: 9, kind: input, shape index: {}]   ;;  %s2074_s10 = inlined_call_operand.hbm [shape: f32[8,8], index: 10, kind: output, shape index: {0}]   ;;  %s2075_s11 = inlined_call_operand.hbm [shape: f32[8,32], index: 11, kind: output, shape index: {1}]   ;;  %s2076_s12 = inlined_call_operand.hbm [shape: f32[8,32], index: 12, kind: output, shape index: {2}]  }
   0x1   :  { %v48_v0 = vld [vmem:[%s2067_s3] sm:$0xff]  ;;  %v49_v1 = vld [vmem:[%s2067_s3 + $0x8] sm:$0xff]  ;;  %1498 = vmatprep.subr.bf16.mxu1 %v1701_v6  ;;  %1383 = vmatprep.mubr.msk.f32.mxu1 %vm1702_vm1, %v1703_v8  ;;  %v189_v10 = vld [vmem:[%s2068_s4 + $0x10] sm:$0xff] }
   0x2   :  { %v40_v2 = vld [vmem:[%s2064_s0] sm:$0xff]  ;;  %v1476_v3 = vpack.c.bf16 %v49_v1, %v48_v0  ;;  %v188_v5 = vld [vmem:[%s2068_s4 + $0x8] sm:$0xff]  ;;  %v190_v11 = vld [vmem:[%s2068_s4 + $0x18] sm:$0xff] }
   0x3   :  { %1330 = vmatprep.mubr.msk.f32.mxu0 %vm57_vm0, %v40_v2  ;;  %v187_v4 = vld [vmem:[%s2068_s4] sm:$0xff]  ;;  %v41_v9 = vld [vmem:[%s2064_s0 + $0x8] sm:$0xff]  ;;  %v42_v12 = vld [vmem:[%s2064_s0 + $0x10] sm:$0xff] }
   0x4   :  { %v1792_v7 = vpack.c.bf16 %v188_v5, %v187_v4  ;;  %1477 = vmatprep.subr.bf16.mxu0 %v1476_v3 }
   0x5   :  { %1479 = vmatpush3.bf16.msra.mxu0 %v1476_v3 }
   0x6   :  { %1500 = vmatpush3.bf16.msra.mxu1 %v1792_v7  ;;  %1480 = vmatprep.subr.bf16.mxu0 %v1701_v6 }
   0x7   :  { %1501 = vmatprep.subr.bf16.mxu1 %v1701_v6 }
   0x8   :  { %19 = vsyncpa [#allocation5], 0  ;;  %1331 = vmatmul.mubr.msk.f32.vlgmr.msra.gmra.mrb[0].mxu0 %vm57_vm0, %v41_v9  ;;  %v1812_v13 = vpack.c.bf16 %v190_v11, %v189_v10  ;;  %v43_v14 = vld [vmem:[%s2064_s0 + $0x18] sm:$0xff]  ;;  %v44_v15 = vld [vmem:[%s2064_s0 + $0x20] sm:$0xff]  ;;  %vm193_vm2 = vcmask 261120   ;;  %s1705_s14 = smov 32  }
   0x9   :  { %1482 = vmatpush3.bf16.msra.mxu0 %v1792_v7  ;;  %1333 = vmatprep.mubr.msk.f32.mxu0 %vm57_vm0, %v42_v12  ;;  %v45_v16 = vld [vmem:[%s2064_s0 + $0x28] sm:$0xff]  ;;  %v46_v17 = vld [vmem:[%s2064_s0 + $0x30] sm:$0xff]  ;;  %v47_v18 = vld [vmem:[%s2064_s0 + $0x38] sm:$0xff]  ;;  %s1706_s21 = smov 96   ;;  %s1707_s30 = smov [#allocation4]  }
   0xa   :  { %1483 = vmatprep.subr.bf16.mxu0 %v1701_v6  ;;  %1503 = vmatpush3.bf16.msra.mxu1 %v1812_v13  ;;  %v191_v19 = vld [vmem:[%s2065_s1] sm:$0xff]  ;;  %s1704_s1 = smov 64   ;;  %s1201_s0 = sshll.u32 %s1707_s30, 4  ;;  %s1202_s0 = int_to_ptr.vmem [resolvable:$true] %s1201_s0 }
   0xb   :  { %1510 = vmatprep.subr.bf16.mxu1 %v1701_v6  ;;  %v1226_v20 = vld [vmem:[%s2069_s5] ss:$0 sm:$0xff]  ;;  %s1631_s3 = scalar_lea.vmem %s1202_s0, 128  ;;  %p1636_p1 = scmp.lt.s32.totalorder %s1202_s0, %s1202_s0 }
   0xc   :  { %1334 = vmatmul.mubr.msk.f32.gmra.mrb[2].mxu0 %vm57_vm0, %v43_v14  ;;  %v192_v41 = vld [vmem:[%s2066_s2] sm:$0xff]  ;;  %p1632_p0 = scmp.ne.s32.totalorder %s1202_s0, %s1631_s3  ;;  %p1637_p2 = scmp.lt.s32.totalorder %s1631_s3, %s1631_s3 }
   0xd   :  { %1336 = vmatprep.mubr.msk.f32.mxu0 %vm57_vm0, %v44_v15  ;;  %1485 = vmatpush3.bf16.msra.mxu0 %v1812_v13 }
   0xe   :  { %1486 = vmatprep.subr.bf16.mxu0 %v1701_v6  ;;  %p1638_p3 = por %p1637_p2, %p1636_p1 }
  0x10   :  { %1337 = vmatmul.mubr.msk.f32.gmra.mrb[4].mxu0 %vm57_vm0, %v45_v16  ;;  %p1639_p4 = pnand %p1638_p3, %p1632_p0 }
  0x11   :  { %1339 = vmatprep.mubr.msk.f32.mxu0 %vm57_vm0, %v46_v17 }
  0x14   :  { %1340 = vmatmul.mubr.msk.f32.gmra.mrb[6].mxu0 %vm57_vm0, %v47_v18 }
  0x15   :  { %1350 = vmatprep.mubr.msk.f32.mxu0 %vm1702_vm1, %v1703_v8 }
  0x18   :  { %1351 = vmatmul.mubr.msk.f32.vlgmr.msra.gmra.mrb[8].mxu0 %vm193_vm2, %v191_v19 }
  0x19   :  { %1488 = vmatpush3.bf16.msra.mxu0 %v1792_v7  ;;  %1361 = vmatprep.mubr.msk.f32.mxu0 %vm1702_vm1, %v1703_v8 }
  0x1a   :  { %1489 = vmatprep.subr.bf16.mxu0 %v1701_v6 }
  0x1d   :  { %1491 = vmatpush3.bf16.msra.mxu0 %v1812_v13 }
  0x1e   :  { %1492 = vmatprep.subr.bf16.mxu0 %v1701_v6 }
  0xdb   :  { %v1332_v21 = vpop.f32.mrb[0].mxu0 }
  0xdc   :  { %v154_v22 = vadd.f32 %v1332_v21, %v1226_v20  ;;  %v148_v23 = vpop.f32.mrb[1].mxu0 }
  0xdd   :  { %v149_v36 = vadd.f32 %v1226_v20, %v148_v23 }
  0xdf   :  { %v1335_v24 = vpop.f32.mrb[2].mxu0 }
  0xe0   :  { %v1856_v25 = vadd.f32 %v1335_v24, %v1226_v20  ;;  %v158_v26 = vpop.f32.mrb[3].mxu0 }
  0xe1   :  { %v1858_v27 = vadd.f32 %v1226_v20, %v158_v26 }
  0xe3   :  { %v1338_v28 = vpop.f32.mrb[4].mxu0 }
  0xe4   :  { %v1860_v29 = vadd.f32 %v1338_v28, %v1226_v20  ;;  %v168_v30 = vpop.f32.mrb[5].mxu0 }
  0xe5   :  { %v1862_v31 = vadd.f32 %v1226_v20, %v168_v30 }
  0xe7   :  { %v1341_v32 = vpop.f32.mrb[6].mxu0 }
  0xe8   :  { %v1864_v33 = vadd.f32 %v1341_v32, %v1226_v20  ;;  %v178_v34 = vpop.f32.mrb[7].mxu0 }
  0xe9   :  { %v1866_v35 = vadd.f32 %v1226_v20, %v178_v34 }
  0xeb   :  { %v263_v37 = vpop.f32.mrb[8].mxu0 }
  0xec   :  { %v267_v38 = vadd.f32 %v263_v37, %v149_v36  ;;  %v1352_v39 = vpop.f32.mrb[9].mxu0 }
  0xee   :  { %1567 = vtanh.f32 %v267_v38  ;;  %v1236_v42 = vmul.f32 -1.442695, %v267_v38 }
  0xf0   :  { %1569 = vpow2.f32 %v1236_v42 }
  0xf8   :  { %v1568_v40 = vpop.eup %1567 }
  0xf9   :  { %281 = vrot.lane.b32.xlu0 %v1568_v40, %s1704_s1 }
  0xfa   :  { %v1570_v43 = vpop.eup %1569 }
  0xfb   :  { %v271_v44 = vadd.f32 1.0, %v1570_v43 }
  0xfd   :  { %276 = vrot.lane.b32.xlu0 %v192_v41, %s1705_s14  ;;  %1571 = vrcp.f32 %v271_v44 }
 0x107   :  { %v1572_v45 = vpop.eup %1571 }
 0x16b   :  { %v282_v46 = vpop.permute.xlu0 %281 }
 0x16c   :  { %v284_v47 = vmul.f32 %v1572_v45, %v282_v46 }
 0x16e   :  { %286 = vrot.lane.b32.xlu1 %v284_v47, %s1705_s14 }
 0x16f   :  { %v277_v48 = vpop.permute.xlu0 %276 }
 0x170   :  { %v279_v49 = vmul.f32 %v1572_v45, %v277_v48 }
 0x1e0   :  { %v287_v50 = vpop.permute.xlu1 %286 }
 0x1e1   :  { %v289_v51 = vadd.f32 %v287_v50, %v279_v49 }
 0x1e3   :  { %1573 = vtanh.f32 %v289_v51 }
 0x1ed   :  { %v1574_v52 = vpop.eup %1573 }
 0x1ee   :  { %292 = vrot.lane.b32.xlu1 %v1574_v52, %s1704_s1 }
 0x260   :  { %v293_v53 = vpop.permute.xlu1 %292 }
 0x261   :  { %v295_v54 = vmul.f32 %v1572_v45, %v293_v53 }
 0x263   :  { %297 = vrot.lane.b32.xlu0 %v295_v54, %s1705_s14 }
 0x2d5   :  { %v298_v55 = vpop.permute.xlu0 %297 }
 0x2d6   :  { %1362 = vmatmul.mubr.msk.f32.vlgmr.msra.gmra.mrb[10].mxu0 %vm193_vm2, %v298_v55 }
 0x2d7   :  { %1494 = vmatpush3.bf16.msra.mxu0 %v1792_v7  ;;  %1372 = vmatprep.mubr.msk.f32.mxu0 %vm1702_vm1, %v1703_v8 }
 0x2d8   :  { %1495 = vmatprep.subr.bf16.mxu0 %v1701_v6 }
 0x2db   :  { %1497 = vmatpush3.bf16.msra.mxu0 %v1812_v13 }
 0x2dc   :  { %1504 = vmatprep.subr.bf16.mxu0 %v1701_v6 }
 0x3a9   :  { %v367_v56 = vpop.f32.mrb[10].mxu0 }
 0x3aa   :  { %v371_v57 = vadd.f32 %v367_v56, %v154_v22  ;;  %v1363_v58 = vpop.f32.mrb[11].mxu0 }
 0x3ac   :  { %1575 = vtanh.f32 %v371_v57  ;;  %v1238_v60 = vmul.f32 -1.442695, %v371_v57 }
 0x3ae   :  { %1577 = vpow2.f32 %v1238_v60 }
 0x3b6   :  { %v1576_v59 = vpop.eup %1575 }
 0x3b7   :  { %381 = vrot.lane.b32.xlu1 %v1576_v59, %s1704_s1 }
 0x3b8   :  { %v1578_v61 = vpop.eup %1577 }
 0x3b9   :  { %v375_v62 = vadd.f32 1.0, %v1578_v61 }
 0x3bb   :  { %1579 = vrcp.f32 %v375_v62 }
 0x3c5   :  { %v1580_v63 = vpop.eup %1579 }
 0x3c6   :  { %v379_v2 = vmul.f32 %v1580_v63, %v289_v51 }
 0x429   :  { %v382_v0 = vpop.permute.xlu1 %381 }
 0x42a   :  { %v384_v1 = vmul.f32 %v1580_v63, %v382_v0 }
 0x42c   :  { %386 = vrot.lane.b32.xlu0 %v384_v1, %s1705_s14 }
 0x49e   :  { %v387_v3 = vpop.permute.xlu0 %386 }
 0x49f   :  { %v389_v4 = vadd.f32 %v387_v3, %v379_v2 }
 0x4a1   :  { %1581 = vtanh.f32 %v389_v4 }
 0x4ab   :  { %v1582_v5 = vpop.eup %1581 }
 0x4ac   :  { %392 = vrot.lane.b32.xlu1 %v1582_v5, %s1704_s1 }
 0x51e   :  { %v393_v9 = vpop.permute.xlu1 %392 }
 0x51f   :  { %v395_v10 = vmul.f32 %v1580_v63, %v393_v9 }
 0x521   :  { %397 = vrot.lane.b32.xlu0 %v395_v10, %s1705_s14 }
 0x593   :  { %v398_v11 = vpop.permute.xlu0 %397 }
 0x594   :  { %1373 = vmatmul.mubr.msk.f32.vlgmr.msra.gmra.mrb[12].mxu0 %vm193_vm2, %v398_v11 }
 0x595   :  { %1506 = vmatpush3.bf16.msra.mxu0 %v1792_v7  ;;  %1394 = vmatprep.mubr.msk.f32.mxu0 %vm1702_vm1, %v1703_v8 }
 0x596   :  { %1507 = vmatprep.subr.bf16.mxu0 %v1701_v6 }
 0x599   :  { %1509 = vmatpush3.bf16.msra.mxu0 %v1812_v13 }
 0x59a   :  { %1516 = vmatprep.subr.bf16.mxu0 %v1701_v6 }
 0x667   :  { %v467_v12 = vpop.f32.mrb[12].mxu0 }
 0x668   :  { %v471_v14 = vadd.f32 %v467_v12, %v1858_v27  ;;  %v1374_v15 = vpop.f32.mrb[13].mxu0 }
 0x66a   :  { %1583 = vtanh.f32 %v471_v14  ;;  %v1240_v17 = vmul.f32 -1.442695, %v471_v14 }
 0x66c   :  { %1585 = vpow2.f32 %v1240_v17 }
 0x674   :  { %v1584_v16 = vpop.eup %1583 }
 0x675   :  { %481 = vrot.lane.b32.xlu1 %v1584_v16, %s1704_s1 }
 0x676   :  { %v1586_v18 = vpop.eup %1585 }
 0x677   :  { %v475_v19 = vadd.f32 1.0, %v1586_v18 }
 0x679   :  { %1587 = vrcp.f32 %v475_v19 }
 0x683   :  { %v1588_v20 = vpop.eup %1587 }
 0x684   :  { %v479_v23 = vmul.f32 %v1588_v20, %v389_v4 }
 0x6e7   :  { %v482_v21 = vpop.permute.xlu1 %481 }
 0x6e8   :  { %v484_v22 = vmul.f32 %v1588_v20, %v482_v21 }
 0x6ea   :  { %486 = vrot.lane.b32.xlu0 %v484_v22, %s1705_s14 }
 0x75c   :  { %v487_v24 = vpop.permute.xlu0 %486 }
 0x75d   :  { %v489_v26 = vadd.f32 %v487_v24, %v479_v23 }
 0x75f   :  { %1589 = vtanh.f32 %v489_v26 }
 0x769   :  { %v1590_v27 = vpop.eup %1589 }
 0x76a   :  { %492 = vrot.lane.b32.xlu1 %v1590_v27, %s1704_s1 }
 0x7dc   :  { %v493_v28 = vpop.permute.xlu1 %492 }
 0x7dd   :  { %v495_v30 = vmul.f32 %v1588_v20, %v493_v28 }
 0x7df   :  { %497 = vrot.lane.b32.xlu0 %v495_v30, %s1705_s14 }
 0x851   :  { %v498_v32 = vpop.permute.xlu0 %497 }
 0x852   :  { %1384 = vmatmul.mubr.msk.f32.vlgmr.msra.gmra.mrb[0].mxu1 %vm193_vm2, %v498_v32 }
 0x853   :  { %1512 = vmatpush3.bf16.msra.mxu1 %v1792_v7  ;;  %1405 = vmatprep.mubr.msk.f32.mxu1 %vm1702_vm1, %v1703_v8 }
 0x854   :  { %1513 = vmatprep.subr.bf16.mxu1 %v1701_v6 }
 0x857   :  { %1515 = vmatpush3.bf16.msra.mxu1 %v1812_v13 }
 0x858   :  { %1522 = vmatprep.subr.bf16.mxu1 %v1701_v6 }
 0x925   :  { %v567_v34 = vpop.f32.mrb[0].mxu1 }
 0x926   :  { %v571_v36 = vadd.f32 %v567_v34, %v1856_v25  ;;  %v1385_v37 = vpop.f32.mrb[1].mxu1 }
 0x928   :  { %1591 = vtanh.f32 %v571_v36  ;;  %v1242_v39 = vmul.f32 -1.442695, %v571_v36 }
 0x92a   :  { %1593 = vpow2.f32 %v1242_v39 }
 0x932   :  { %v1592_v38 = vpop.eup %1591 }
 0x933   :  { %581 = vrot.lane.b32.xlu1 %v1592_v38, %s1704_s1 }
 0x934   :  { %v1594_v40 = vpop.eup %1593 }
 0x935   :  { %v575_v41 = vadd.f32 1.0, %v1594_v40 }
 0x937   :  { %1595 = vrcp.f32 %v575_v41 }
 0x941   :  { %v1596_v42 = vpop.eup %1595 }
 0x942   :  { %v579_v45 = vmul.f32 %v1596_v42, %v489_v26 }
 0x9a5   :  { %v582_v43 = vpop.permute.xlu1 %581 }
 0x9a6   :  { %v584_v44 = vmul.f32 %v1596_v42, %v582_v43 }
 0x9a8   :  { %586 = vrot.lane.b32.xlu0 %v584_v44, %s1705_s14 }
 0xa1a   :  { %v587_v46 = vpop.permute.xlu0 %586 }
 0xa1b   :  { %v589_v47 = vadd.f32 %v587_v46, %v579_v45 }
 0xa1d   :  { %1597 = vtanh.f32 %v589_v47 }
 0xa27   :  { %v1598_v25 = vpop.eup %1597 }
 0xa28   :  { %592 = vrot.lane.b32.xlu1 %v1598_v25, %s1704_s1 }
 0xa9a   :  { %v593_v48 = vpop.permute.xlu1 %592 }
 0xa9b   :  { %v595_v49 = vmul.f32 %v1596_v42, %v593_v48 }
 0xa9d   :  { %597 = vrot.lane.b32.xlu0 %v595_v49, %s1705_s14 }
 0xb0f   :  { %v598_v50 = vpop.permute.xlu0 %597 }
 0xb10   :  { %1395 = vmatmul.mubr.msk.f32.vlgmr.msra.gmra.mrb[14].mxu0 %vm193_vm2, %v598_v50 }
 0xb11   :  { %1518 = vmatpush3.bf16.msra.mxu0 %v1792_v7  ;;  %1416 = vmatprep.mubr.msk.f32.mxu0 %vm1702_vm1, %v1703_v8 }
 0xb12   :  { %1519 = vmatprep.subr.bf16.mxu0 %v1701_v6 }
 0xb15   :  { %1521 = vmatpush3.bf16.msra.mxu0 %v1812_v13 }
 0xb16   :  { %1528 = vmatprep.subr.bf16.mxu0 %v1701_v6 }
 0xbe3   :  { %v667_v51 = vpop.f32.mrb[14].mxu0 }
 0xbe4   :  { %v671_v52 = vadd.f32 %v667_v51, %v1862_v31  ;;  %v1396_v53 = vpop.f32.mrb[15].mxu0 }
 0xbe5   :  { %v1007_v53 = vld [vmem:[%s2070_s6 + $0x8] sm:$0xff] }
 0xbe6   :  { %1599 = vtanh.f32 %v671_v52  ;;  %v1244_v55 = vmul.f32 -1.442695, %v671_v52 }
 0xbe8   :  { %1601 = vpow2.f32 %v1244_v55 }
 0xbf0   :  { %v1600_v54 = vpop.eup %1599 }
 0xbf1   :  { %681 = vrot.lane.b32.xlu1 %v1600_v54, %s1704_s1  ;;  %v1008_v54 = vld [vmem:[%s2070_s6 + $0x10] sm:$0xff] }
 0xbf2   :  { %v1602_v56 = vpop.eup %1601 }
 0xbf3   :  { %v675_v57 = vadd.f32 1.0, %v1602_v56  ;;  %v1009_v56 = vld [vmem:[%s2070_s6 + $0x18] sm:$0xff] }
 0xbf5   :  { %1603 = vrcp.f32 %v675_v57  ;;  %v1532_v57 = vpack.c.bf16 %v1009_v56, %v1008_v54 }
 0xbff   :  { %v1604_v58 = vpop.eup %1603 }
 0xc00   :  { %v679_v61 = vmul.f32 %v1604_v58, %v589_v47 }
 0xc63   :  { %v682_v59 = vpop.permute.xlu1 %681 }
 0xc64   :  { %v684_v60 = vmul.f32 %v1604_v58, %v682_v59  ;;  %v1090_v59 = vld [vmem:[%s2072_s8] sm:$0xff] }
 0xc66   :  { %686 = vrot.lane.b32.xlu0 %v684_v60, %s1705_s14  ;;  %v1091_v60 = vld [vmem:[%s2072_s8 + $0x8] sm:$0xff] }
 0xcd8   :  { %v687_v62 = vpop.permute.xlu0 %686 }
 0xcd9   :  { %v689_v63 = vadd.f32 %v687_v62, %v679_v61  ;;  %v1092_v61 = vld [vmem:[%s2072_s8 + $0x10] sm:$0xff]  ;;  %v1535_v62 = vpack.c.bf16 %v1091_v60, %v1090_v59 }
 0xcdb   :  { %1605 = vtanh.f32 %v689_v63 }
 0xce5   :  { %v1606_v31 = vpop.eup %1605 }
 0xce6   :  { %692 = vrot.lane.b32.xlu1 %v1606_v31, %s1704_s1 }
 0xd58   :  { %v693_v0 = vpop.permute.xlu1 %692 }
 0xd59   :  { %v695_v1 = vmul.f32 %v1604_v58, %v693_v0  ;;  %v1094_v0 = vld [vmem:[%s2072_s8 + $0x20] sm:$0xff] }
 0xd5b   :  { %697 = vrot.lane.b32.xlu0 %v695_v1, %s1705_s14  ;;  %v1095_v1 = vld [vmem:[%s2072_s8 + $0x28] sm:$0xff] }
 0xdcd   :  { %v698_v2 = vpop.permute.xlu0 %697 }
 0xdce   :  { %1406 = vmatmul.mubr.msk.f32.vlgmr.msra.gmra.mrb[2].mxu1 %vm193_vm2, %v698_v2  ;;  %v1541_v2 = vpack.c.bf16 %v1095_v1, %v1094_v0 }
 0xdcf   :  { %1524 = vmatpush3.bf16.msra.mxu1 %v1792_v7  ;;  %1427 = vmatprep.mubr.msk.f32.mxu1 %vm1702_vm1, %v1703_v8 }
 0xdd0   :  { %1525 = vmatprep.subr.bf16.mxu1 %v1701_v6 }
 0xdd3   :  { %1527 = vmatpush3.bf16.msra.mxu1 %v1812_v13 }
 0xdd4   :  { %1534 = vmatprep.subr.bf16.mxu1 %v1701_v6 }
 0xea1   :  { %v767_v3 = vpop.f32.mrb[2].mxu1 }
 0xea2   :  { %v771_v4 = vadd.f32 %v767_v3, %v1860_v29  ;;  %v1407_v5 = vpop.f32.mrb[3].mxu1  ;;  %v1096_v3 = vld [vmem:[%s2072_s8 + $0x30] sm:$0xff] }
 0xea4   :  { %1607 = vtanh.f32 %v771_v4  ;;  %v1246_v10 = vmul.f32 -1.442695, %v771_v4  ;;  %v1097_v4 = vld [vmem:[%s2072_s8 + $0x38] sm:$0xff] }
 0xea6   :  { %1609 = vpow2.f32 %v1246_v10  ;;  %v1544_v10 = vpack.c.bf16 %v1097_v4, %v1096_v3 }
 0xeae   :  { %v1608_v9 = vpop.eup %1607 }
 0xeaf   :  { %781 = vrot.lane.b32.xlu1 %v1608_v9, %s1704_s1 }
 0xeb0   :  { %v1610_v7 = vpop.eup %1609 }
 0xeb1   :  { %v775_v11 = vadd.f32 1.0, %v1610_v7  ;;  %v1098_v7 = vld [vmem:[%s2072_s8 + $0x40] sm:$0xff] }
 0xeb3   :  { %1611 = vrcp.f32 %v775_v11  ;;  %v1099_v11 = vld [vmem:[%s2072_s8 + $0x48] sm:$0xff] }
 0xebd   :  { %v1612_v12 = vpop.eup %1611 }
 0xebe   :  { %v779_v13 = vmul.f32 %v1612_v12, %v689_v63  ;;  %v1093_v63 = vld [vmem:[%s2072_s8 + $0x18] sm:$0xff] }
 0xebf   :  { %v1538_v31 = vpack.c.bf16 %v1093_v63, %v1092_v61 }
 0xf21   :  { %v782_v14 = vpop.permute.xlu1 %781 }
 0xf22   :  { %v784_v15 = vmul.f32 %v1612_v12, %v782_v14  ;;  %v1547_v14 = vpack.c.bf16 %v1099_v11, %v1098_v7 }
 0xf24   :  { %786 = vrot.lane.b32.xlu0 %v784_v15, %s1705_s14  ;;  %v1100_v15 = vld [vmem:[%s2072_s8 + $0x50] sm:$0xff] }
 0xf96   :  { %v787_v16 = vpop.permute.xlu0 %786 }
 0xf97   :  { %v789_v17 = vadd.f32 %v787_v16, %v779_v13  ;;  %v1101_v13 = vld [vmem:[%s2072_s8 + $0x58] sm:$0xff] }
 0xf98   :  { %v1550_v16 = vpack.c.bf16 %v1101_v13, %v1100_v15 }
 0xf99   :  { %1613 = vtanh.f32 %v789_v17 }
 0xfa3   :  { %v1614_v29 = vpop.eup %1613 }
 0xfa4   :  { %792 = vrot.lane.b32.xlu1 %v1614_v29, %s1704_s1  ;;  %v1103_v29 = vld [vmem:[%s2072_s8 + $0x68] sm:$0xff] }
0x1016   :  { %v793_v18 = vpop.permute.xlu1 %792 }
0x1017   :  { %v795_v19 = vmul.f32 %v1612_v12, %v793_v18 }
0x1019   :  { %797 = vrot.lane.b32.xlu0 %v795_v19, %s1705_s14 }
0x108b   :  { %v798_v20 = vpop.permute.xlu0 %797 }
0x108c   :  { %1417 = vmatmul.mubr.msk.f32.vlgmr.msra.gmra.mrb[16].mxu0 %vm193_vm2, %v798_v20  ;;  %v1104_v20 = vld [vmem:[%s2072_s8 + $0x70] sm:$0xff] }
0x108d   :  { %1438 = vmatprep.mubr.msk.f32.mxu0 %vm1702_vm1, %v1703_v8 }
0x115f   :  { %v867_v21 = vpop.f32.mrb[16].mxu0 }
0x1160   :  { %v871_v22 = vadd.f32 %v867_v21, %v1866_v35  ;;  %v1418_v23 = vpop.f32.mrb[17].mxu0  ;;  %v1105_v21 = vld [vmem:[%s2072_s8 + $0x78] sm:$0xff] }
0x1161   :  { %v1251_v23 = vld [vmem:[%s2071_s7] ss:$0 sm:$0xff] }
0x1162   :  { %1615 = vtanh.f32 %v871_v22  ;;  %v1248_v26 = vmul.f32 -1.442695, %v871_v22  ;;  %v1556_v22 = vpack.c.bf16 %v1105_v21, %v1104_v20 }
0x1164   :  { %1617 = vpow2.f32 %v1248_v26 }
0x116c   :  { %v1616_v24 = vpop.eup %1615 }
0x116d   :  { %881 = vrot.lane.b32.xlu1 %v1616_v24, %s1704_s1 }
0x116e   :  { %v1618_v27 = vpop.eup %1617 }
0x116f   :  { %v875_v28 = vadd.f32 1.0, %v1618_v27 }
0x1171   :  { %1619 = vrcp.f32 %v875_v28 }
0x117b   :  { %v1620_v30 = vpop.eup %1619 }
0x117c   :  { %v879_v36 = vmul.f32 %v1620_v30, %v789_v17  ;;  %v1102_v17 = vld [vmem:[%s2072_s8 + $0x60] sm:$0xff] }
0x117d   :  { %v1553_v18 = vpack.c.bf16 %v1103_v29, %v1102_v17 }
0x11df   :  { %v882_v32 = vpop.permute.xlu1 %881 }
0x11e0   :  { %v884_v34 = vmul.f32 %v1620_v30, %v882_v32 }
0x11e2   :  { %886 = vrot.lane.b32.xlu0 %v884_v34, %s1705_s14 }
0x1254   :  { %v887_v37 = vpop.permute.xlu0 %886 }
0x1255   :  { %v889_v38 = vadd.f32 %v887_v37, %v879_v36 }
0x1257   :  { %1621 = vtanh.f32 %v889_v38 }
0x1261   :  { %v1622_v35 = vpop.eup %1621 }
0x1262   :  { %892 = vrot.lane.b32.xlu1 %v1622_v35, %s1704_s1 }
0x12d4   :  { %v893_v39 = vpop.permute.xlu1 %892 }
0x12d5   :  { %v895_v40 = vmul.f32 %v1620_v30, %v893_v39 }
0x12d7   :  { %897 = vrot.lane.b32.xlu0 %v895_v40, %s1705_s14 }
0x1349   :  { %v898_v41 = vpop.permute.xlu0 %897 }
0x134a   :  { %1428 = vmatmul.mubr.msk.f32.vlgmr.msra.gmra.mrb[4].mxu1 %vm193_vm2, %v898_v41 }
0x134b   :  { %1473 = vmatprep.mubr.msk.f32.mxu1 %vm1702_vm1, %v1703_v8  ;;  %1536 = vmatpush3.bf16.msra.mxu1 %v1535_v62 }
0x134c   :  { %1537 = vmatprep.subr.bf16.mxu1 %v1701_v6 }
0x134f   :  { %1539 = vmatpush3.bf16.msra.mxu1 %v1538_v31 }
0x1350   :  { %1540 = vmatprep.subr.bf16.mxu1 %v1701_v6 }
0x1353   :  { %1542 = vmatpush3.bf16.msra.mxu1 %v1541_v2 }
0x1354   :  { %1543 = vmatprep.subr.bf16.mxu1 %v1701_v6 }
0x1357   :  { %1545 = vmatpush3.bf16.msra.mxu1 %v1544_v10 }
0x1358   :  { %1546 = vmatprep.subr.bf16.mxu1 %v1701_v6 }
0x135b   :  { %1548 = vmatpush3.bf16.msra.mxu1 %v1547_v14 }
0x135c   :  { %1549 = vmatprep.subr.bf16.mxu1 %v1701_v6 }
0x135f   :  { %1551 = vmatpush3.bf16.msra.mxu1 %v1550_v16 }
0x1360   :  { %1552 = vmatprep.subr.bf16.mxu1 %v1701_v6 }
0x1363   :  { %1554 = vmatpush3.bf16.msra.mxu1 %v1553_v18 }
0x1364   :  { %1555 = vmatprep.subr.bf16.mxu1 %v1701_v6 }
0x1367   :  { %1557 = vmatpush3.bf16.msra.mxu1 %v1556_v22 }
0x141d   :  { %v967_v42 = vpop.f32.mrb[4].mxu1 }
0x141e   :  { %v971_v43 = vadd.f32 %v967_v42, %v1864_v33  ;;  %v1429_v44 = vpop.f32.mrb[5].mxu1  ;;  %v1006_v33 = vld [vmem:[%s2070_s6] sm:$0xff] }
0x141f   :  { %v1529_v55 = vpack.c.bf16 %v1007_v53, %v1006_v33 }
0x1420   :  { %1623 = vtanh.f32 %v971_v43  ;;  %v1250_v46 = vmul.f32 -1.442695, %v971_v43 }
0x1421   :  { %1530 = vmatpush3.bf16.msra.mxu0 %v1529_v55 }
0x1422   :  { %1625 = vpow2.f32 %v1250_v46  ;;  %1531 = vmatprep.subr.bf16.mxu0 %v1701_v6 }
0x1425   :  { %1533 = vmatpush3.bf16.msra.mxu0 %v1532_v57 }
0x142a   :  { %v1624_v45 = vpop.eup %1623 }
0x142b   :  { %981 = vrot.lane.b32.xlu1 %v1624_v45, %s1704_s1 }
0x142c   :  { %v1626_v47 = vpop.eup %1625 }
0x142d   :  { %v975_v25 = vadd.f32 1.0, %v1626_v47 }
0x142f   :  { %1627 = vrcp.f32 %v975_v25 }
0x1439   :  { %v1628_v48 = vpop.eup %1627 }
0x143a   :  { %v979_v51 = vmul.f32 %v1628_v48, %v889_v38 }
0x149d   :  { %v982_v49 = vpop.permute.xlu1 %981 }
0x149e   :  { %v984_v50 = vmul.f32 %v1628_v48, %v982_v49 }
0x14a0   :  { %986 = vrot.lane.b32.xlu0 %v984_v50, %s1705_s14 }
0x1512   :  { %v987_v8 = vpop.permute.xlu0 %986 }
0x1513   :  { %v989_v52 = vadd.f32 %v987_v8, %v979_v51 }
0x1515   :  { %1629 = vtanh.f32 %v989_v52 }
0x151f   :  { %v1630_v58 = vpop.eup %1629 }
0x1520   :  { %992 = vrot.lane.b32.xlu1 %v1630_v58, %s1704_s1 }
0x1524   :  { %1002 = vrot.lane.b32.xlu1 %v989_v52, %s1706_s21 }
0x1592   :  { %v993_v5 = vpop.permute.xlu1 %992 }
0x1593   :  { %v995_v9 = vmul.f32 %v1628_v48, %v993_v5 }
0x1595   :  { %997 = vrot.lane.b32.xlu0 %v995_v9, %s1705_s14 }
0x1596   :  { %v1003_v12 = vpop.permute.xlu1 %1002 }
0x1597   :  { %1005 = vst.msk [vmem:[#allocation6] sm:$0xff] %vm193_vm2, %v1003_v12 }
0x1607   :  { %v998_v19 = vpop.permute.xlu0 %997 }
0x1608   :  { %1000 = vst.msk [vmem:[#allocation4] sm:$0xff] %vm193_vm2, %v998_v19  ;;  %1439 = vmatmul.mubr.msk.f32.vlgmr.msra.gmra.mrb[18].mxu0 %vm193_vm2, %v998_v19 }
0x16db   :  { %v1085_v6 = vpop.f32.mrb[18].mxu0 }
0x16dc   :  { %v1086_v24 = vadd.f32 %v1251_v23, %v1085_v6  ;;  %v1440_v26 = vpop.f32.mrb[19].mxu0 }
0x16de   :  { %v1089_v27 = vmax.f32 %v1086_v24, 0.0 }
0x16e0   :  { %1474 = vmatmul.mubr.f32.vlgmr.msra.gmra.mrb[6].mxu1 %v1089_v27 }
0x16e1   :  { %1642 = shalt.err (!%p1639_p4)
}
0x16e2   :  { %s1643_s5 = scalar_lea.hbm %s2075_s11, 128 }
0x16e3   :  { %p1644_p5 = scmp.ne.s32.totalorder %s2075_s11, %s1643_s5  ;;  %p1647_p6 = scmp.lt.u32.totalorder %s1643_s5, %s2075_s11 }
0x16e5   :  { %p1649_p7 = pnand %p1647_p6, %p1644_p5 }
0x16e7   :  { %1652 = shalt.err (!%p1649_p7)
}
0x16e8   :  { %1204 = dma.vmem_to_hbm [thread:$0]  %s1202_s0, 128, %s2075_s11, [#allocation5]  }
0x16e9   :  { %s1708_s18 = smov [#allocation6]  }
0x16ea   :  { %s1211_s19 = sshll.u32 %s1708_s18, 4  ;;  %s1212_s19 = int_to_ptr.vmem [resolvable:$true] %s1211_s19 }
0x16eb   :  { %s1653_s4 = scalar_lea.vmem %s1212_s19, 128  ;;  %p1658_p9 = scmp.lt.s32.totalorder %s1212_s19, %s1212_s19 }
0x16ec   :  { %p1654_p8 = scmp.ne.s32.totalorder %s1212_s19, %s1653_s4  ;;  %p1659_p10 = scmp.lt.s32.totalorder %s1653_s4, %s1653_s4 }
0x16ee   :  { %p1660_p11 = por %p1659_p10, %p1658_p9 }
0x16f0   :  { %p1661_p12 = pnand %p1660_p11, %p1654_p8 }
0x16f2   :  { %1664 = shalt.err (!%p1661_p12)
}
0x16f3   :  { %s1665_s14 = scalar_lea.hbm %s2076_s12, 128 }
0x16f4   :  { %p1666_p13 = scmp.ne.s32.totalorder %s2076_s12, %s1665_s14  ;;  %p1669_p0 = scmp.lt.u32.totalorder %s1665_s14, %s2076_s12 }
0x16f6   :  { %p1671_p1 = pnand %p1669_p0, %p1666_p13 }
0x16f8   :  { %1674 = shalt.err (!%p1671_p1)
}
0x16f9   :  { %1214 = dma.vmem_to_hbm [thread:$0]  %s1212_s19, 128, %s2076_s12, [#allocation5]   ;;  %v1253_v28 = vld [vmem:[%s2073_s9] ss:$0 sm:$0xff]  ;;  %vm1183_vm3 = vcmask 64512  }
0x16fa   :  { %s1709_s28 = smov [#allocation2]  }
0x16fb   :  { %s1191_s29 = sshll.u32 %s1709_s28, 4  ;;  %s1192_s29 = int_to_ptr.vmem [resolvable:$true] %s1191_s29 }
0x16fc   :  { %s1675_s30 = scalar_lea.vmem %s1192_s29, 128  ;;  %p1680_p3 = scmp.lt.s32.totalorder %s1192_s29, %s1192_s29 }
0x16fd   :  { %p1676_p2 = scmp.ne.s32.totalorder %s1192_s29, %s1675_s30  ;;  %p1681_p4 = scmp.lt.s32.totalorder %s1675_s30, %s1675_s30 }
0x16ff   :  { %p1682_p5 = por %p1681_p4, %p1680_p3 }
0x1701   :  { %p1683_p6 = pnand %p1682_p5, %p1676_p2 }
0x17b3   :  { %v1179_v30 = vpop.f32.mrb[6].mxu1 }
0x17b4   :  { %v1180_v32 = vadd.f32 %v1253_v28, %v1179_v30  ;;  %v1475_v34 = vpop.f32.mrb[7].mxu1 }
0x17b6   :  { %1184 = vst.msk [vmem:[#allocation2] sm:$0xff] %vm1183_vm3, %v1180_v32 }
0x17b7   :  { %1686 = shalt.err (!%p1683_p6)
}
0x17b8   :  { %s1687_s3 = scalar_lea.hbm %s2074_s10, 128 }
0x17b9   :  { %p1688_p7 = scmp.ne.s32.totalorder %s2074_s10, %s1687_s3  ;;  %p1691_p8 = scmp.lt.u32.totalorder %s1687_s3, %s2074_s10 }
0x17bb   :  { %p1693_p9 = pnand %p1691_p8, %p1688_p7 }
0x17bd   :  { %1696 = shalt.err (!%p1693_p9)
}
0x17be   :  { %1194 = dma.vmem_to_hbm [thread:$0]  %s1192_s29, 128, %s2074_s10, [#allocation3]  }
0x17bf   :  { %1697 = dma.done.wait [#allocation3], 128  }
0x17c0   :  { %1698 = vsyncadd [#allocation3], 4294967168 }
0x17c1   :  { %1699 = dma.done.wait [#allocation5], 256  }
0x17c2   :  { %1700 = vsyncadd [#allocation5], 4294967040 }
0x17c3   :  { %1224 = vsyncpa [#allocation3], 1 }
0x17c4   :  { %1225 = vsyncpa [#allocation5], 1 }

</bundles_post_ra>
